<compile_context>
chip_gen: v7x
topology: tpu7x:2x2x1
jax: 0.10.0
libtpu: 0.0.40
codegen_flags: <defaults>
</compile_context>

<pallas_src>
import functools

import jax
import jax.numpy as jnp
from jax.experimental import pallas as pl
from jax.experimental.pallas import tpu as pltpu


def _round_up(x, m):
    return ((x + m - 1) // m) * m


def _perceptual_loss_kernel(pimg_ref, timg_ref, w_ref, b_ref, m_ref, out_ref, *,
                            img_w, kh, kw, out_wp, inv_n_img, inv_n_lat):
    # One image pair per grid step ("parallel" axis over batch).
    xp = pimg_ref[0]                     # (C_pad, HW_ext) f32, raw pred image
    xt = timg_ref[0]                     # (C_pad, HW_ext) f32, raw target image

    # ---- image-space MSE partial (f32); zero padding contributes 0 ----------
    d = xp - xt
    img_sse = jnp.sum(d * d)

    # ---- feature extractor: in-kernel im2col via lane-shifted slices ---------
    # Normalization folded into weights/bias on the host.
    bias = b_ref[...]                    # (K_pad, 1) f32
    k_pad = w_ref.shape[1]

    def features(x):
        acc = jnp.zeros((k_pad, out_wp), jnp.float32)
        for dy in range(kh):
            for dx in range(kw):
                s = dy * img_w + dx      # flattened tap shift
                xs = jax.lax.slice_in_dim(x, s, s + out_wp, axis=1)
                xs = xs.astype(jnp.bfloat16)                    # (C_pad, out_wp)
                acc = acc + jnp.dot(w_ref[dy * kw + dx], xs,    # (K_pad, C_pad)
                                    preferred_element_type=jnp.float32)
        return jnp.maximum(acc + bias, 0.0)                     # ReLU(conv + b)

    # pred / target features computed independently (no sublane concat).
    fd = (features(xp) - features(xt)) * m_ref[...]   # mask invalid conv positions
    lat_sse = jnp.sum(fd * fd)

    # ---- per-image pre-scaled partial, lane-dense unmasked store -------------
    total = img_sse * inv_n_img + lat_sse * inv_n_lat
    out_ref[...] = jnp.full(out_ref.shape, total, dtype=out_ref.dtype)


def perceptual_loss(pred, target, conv_w, mean, std):
    """pred, target: (N, C, H, W) float32. conv_w: (KH, KW, C, K) (HWIO)."""
    N, C, H, W = pred.shape
    KH, KW, _, K = conv_w.shape
    Ho, Wo = H - KH + 1, W - KW + 1
    T = KH * KW

    C_pad = _round_up(C, 8)
    K_pad = _round_up(K, 8)
    out_wp = _round_up(H * W, 128)                    # conv output positions (padded)
    s_max = (KH - 1) * W + (KW - 1)                   # largest tap shift
    hw_ext = _round_up(out_wp + s_max, 128)           # image slab width (+halo room)

    # ---- fold Normalize(mean, std) into the conv weights ---------------------
    inv_std = (1.0 / std).astype(jnp.float32)
    w_f32 = conv_w.astype(jnp.float32)
    w_scaled = w_f32 * inv_std[None, None, :, None]                    # (KH,KW,C,K)
    bias = -jnp.einsum('c,hwck->k', mean.astype(jnp.float32) * inv_std, w_f32)

    # (T, K_pad, C_pad) tap-major weights: w_taps[t, k, c] = W[dy,dx,c,k] / std[c]
    w_taps = jnp.transpose(w_scaled.reshape(T, C, K), (0, 2, 1))       # (T, K, C)
    w_taps = jnp.pad(w_taps, ((0, 0), (0, K_pad - K), (0, C_pad - C)))
    w_taps = w_taps.astype(jnp.bfloat16)
    bias_col = jnp.pad(bias, (0, K_pad - K)).reshape(K_pad, 1).astype(jnp.float32)

    # Valid-output mask (oy < Ho and ox < Wo), precomputed on the host.
    pos = jnp.arange(out_wp)
    valid = ((pos % W) <= (W - KW)) & ((pos // W) <= (H - KH))
    mask_row = valid.astype(jnp.float32).reshape(1, out_wp)

    # Raw images as lane-dense (N, C_pad, HW_ext) f32 slabs (single HBM pass).
    def prep(x):
        x = x.astype(jnp.float32).reshape(N, C, H * W)
        return jnp.pad(x, ((0, 0), (0, C_pad - C), (0, hw_ext - H * W)))

    pimg = prep(pred)
    timg = prep(target)

    kernel = functools.partial(
        _perceptual_loss_kernel,
        img_w=W, kh=KH, kw=KW, out_wp=out_wp,
        inv_n_img=1.0 / float(N * C * H * W),
        inv_n_lat=1.0 / float(N * Ho * Wo * K))

    out = pl.pallas_call(
        kernel,
        out_shape=jax.ShapeDtypeStruct((N, 8, 128), jnp.float32),
        grid_spec=pltpu.PrefetchScalarGridSpec(
            num_scalar_prefetch=0,
            grid=(N,),
            in_specs=[
                pl.BlockSpec((1, C_pad, hw_ext), lambda n: (n, 0, 0)),   # pred image
                pl.BlockSpec((1, C_pad, hw_ext), lambda n: (n, 0, 0)),   # target image
                pl.BlockSpec((T, K_pad, C_pad), lambda n: (0, 0, 0)),    # folded weights (resident)
                pl.BlockSpec((K_pad, 1), lambda n: (0, 0)),              # folded bias (resident)
                pl.BlockSpec((1, out_wp), lambda n: (0, 0)),             # valid mask (resident)
            ],
            out_specs=pl.BlockSpec((1, 8, 128), lambda n: (n, 0, 0)),    # per-image partial
        ),
        compiler_params=pltpu.CompilerParams(
            dimension_semantics=("parallel",),                           # megacore on v7x
            vmem_limit_bytes=32 * 1024 * 1024),
    )(pimg, timg, w_taps, bias_col, mask_row)

    # Sum the N pre-scaled per-image partials on the host.
    return jnp.sum(out[:, 0, 0])


def reference(pred, target, conv_w, mean, std):
    """Pure-JAX f32 reference matching the PyTorch forward semantics."""
    img_mse = jnp.mean((pred - target) ** 2)

    def feats(x_nchw):
        xn = (x_nchw - mean[None, :, None, None]) / std[None, :, None, None]
        x = jnp.transpose(xn, (0, 2, 3, 1))
        y = jax.lax.conv_general_dilated(
            x, conv_w, window_strides=(1, 1), padding='VALID',
            dimension_numbers=('NHWC', 'HWIO', 'NHWC'))
        return jnp.maximum(y, 0.0)

    lat_mse = jnp.mean((feats(pred) - feats(target)) ** 2)
    return img_mse + lat_mse


if __name__ == "__main__":
    N, C, H, W, K = 2, 4, 16, 16, 8

    key = jax.random.PRNGKey(0)
    k1, k2, k3 = jax.random.split(key, 3)
    pred = jax.random.normal(k1, (N, C, H, W), jnp.float32)
    target = jax.random.normal(k2, (N, C, H, W), jnp.float32)
    # deterministic synthetic "model" weights (3x3 VALID conv, C -> K, HWIO)
    conv_w = 0.1 * jax.random.normal(k3, (3, 3, C, K), jnp.float32)
    # deterministic normalization constants (one per channel)
    mean = jnp.linspace(0.4, 0.6, C).astype(jnp.float32)
    std = jnp.linspace(0.2, 0.3, C).astype(jnp.float32)

    loss_fn = jax.jit(perceptual_loss)
    loss = jax.block_until_ready(loss_fn(pred, target, conv_w, mean, std))
    ref = reference(pred, target, conv_w, mean, std)

    assert jnp.isfinite(loss)
    # bf16 MXU path for the feature matmuls: slightly wider (still tight) tolerance.
    assert jnp.allclose(loss, ref, rtol=2e-2, atol=1e-2), (loss, ref)
    print("KERNEL_OK")
</pallas_src>

<mosaic_0001>
module attributes {stable_mosaic.version = 11 : i64} {
  func.func @_perceptual_loss_kernel(%arg0: i32, %arg1: memref<1x8x384xf32, #tpu.memory_space<vmem>>, %arg2: memref<1x8x384xf32, #tpu.memory_space<vmem>>, %arg3: memref<9x8x8xbf16, #tpu.memory_space<vmem>>, %arg4: memref<8x1xf32, #tpu.memory_space<vmem>>, %arg5: memref<1x256xf32, #tpu.memory_space<vmem>>, %arg6: memref<1x8x128xf32, #tpu.memory_space<vmem>>) attributes {dimension_semantics = [#tpu.dimension_semantics<parallel>], iteration_bounds = array<i64: 2>, scalar_prefetch = 0 : i64, scratch_operands = 0 : i64, tpu.core_type = #tpu.core_type<tc>, window_params = [{transform_indices = @transform_0, window_bounds = array<i64: 1, 8, 384>}, {transform_indices = @transform_1, window_bounds = array<i64: 1, 8, 384>}, {pipeline_mode = #tpu.pipeline_mode<synchronous>, transform_indices = @transform_2, window_bounds = array<i64: 9, 8, 8>}, {pipeline_mode = #tpu.pipeline_mode<synchronous>, transform_indices = @transform_3, window_bounds = array<i64: 8, 1>}, {pipeline_mode = #tpu.pipeline_mode<synchronous>, transform_indices = @transform_4, window_bounds = array<i64: 1, 256>}, {transform_indices = @transform_5, window_bounds = array<i64: 1, 8, 128>}]} {
    %c0 = arith.constant 0 : index
    %c0_0 = arith.constant 0 : index
    %c0_1 = arith.constant 0 : index
    %0 = vector.load %arg1[%c0, %c0_0, %c0_1] : memref<1x8x384xf32, #tpu.memory_space<vmem>>, vector<1x8x384xf32>
    %1 = vector.shape_cast %0 : vector<1x8x384xf32> to vector<8x384xf32>
    %c0_2 = arith.constant 0 : index
    %c0_3 = arith.constant 0 : index
    %c0_4 = arith.constant 0 : index
    %2 = vector.load %arg2[%c0_2, %c0_3, %c0_4] : memref<1x8x384xf32, #tpu.memory_space<vmem>>, vector<1x8x384xf32>
    %3 = vector.shape_cast %2 : vector<1x8x384xf32> to vector<8x384xf32>
    %4 = arith.subf %1, %3 : vector<8x384xf32>
    %5 = arith.mulf %4, %4 : vector<8x384xf32>
    %6 = vector.shape_cast %5 : vector<8x384xf32> to vector<1x8x384xf32>
    %cst = arith.constant dense<0.000000e+00> : vector<1xf32>
    %7 = vector.multi_reduction <add>, %6, %cst [1, 2] : vector<1x8x384xf32> to vector<1xf32>
    %8 = vector.shape_cast %7 : vector<1xf32> to vector<1x1x1xf32>
    %9 = vector.extract %8[0, 0, 0] : f32 from vector<1x1x1xf32>
    %c0_5 = arith.constant 0 : index
    %c0_6 = arith.constant 0 : index
    %10 = vector.load %arg4[%c0_5, %c0_6] : memref<8x1xf32, #tpu.memory_space<vmem>>, vector<8x1xf32>
    %cst_7 = arith.constant 0.000000e+00 : f32
    %11 = vector.broadcast %cst_7 : f32 to vector<8x256xf32>
    %12 = vector.extract_strided_slice %1 {offsets = [0, 0], sizes = [8, 256], strides = [1, 1]} : vector<8x384xf32> to vector<8x256xf32>
    %13 = arith.truncf %12 : vector<8x256xf32> to vector<8x256xbf16>
    %c0_8 = arith.constant 0 : index
    %c0_9 = arith.constant 0 : index
    %c0_10 = arith.constant 0 : index
    %14 = vector.load %arg3[%c0_8, %c0_9, %c0_10] : memref<9x8x8xbf16, #tpu.memory_space<vmem>>, vector<1x8x8xbf16>
    %15 = vector.shape_cast %14 : vector<1x8x8xbf16> to vector<8x8xbf16>
    %cst_11 = arith.constant dense<0.000000e+00> : vector<8x256xf32>
    %16 = tpu.matmul %15, %13, %cst_11 {dimension_numbers = #tpu.dot_dimension_numbers<[1], [0], [0], [1], [0, 0, 1, 1], [], []>} : vector<8x8xbf16>, vector<8x256xbf16>, vector<8x256xf32> -> vector<8x256xf32>
    %17 = arith.addf %11, %16 : vector<8x256xf32>
    %18 = vector.extract_strided_slice %1 {offsets = [0, 1], sizes = [8, 256], strides = [1, 1]} : vector<8x384xf32> to vector<8x256xf32>
    %19 = arith.truncf %18 : vector<8x256xf32> to vector<8x256xbf16>
    %c1 = arith.constant 1 : index
    %c0_12 = arith.constant 0 : index
    %c0_13 = arith.constant 0 : index
    %20 = vector.load %arg3[%c1, %c0_12, %c0_13] : memref<9x8x8xbf16, #tpu.memory_space<vmem>>, vector<1x8x8xbf16>
    %21 = vector.shape_cast %20 : vector<1x8x8xbf16> to vector<8x8xbf16>
    %cst_14 = arith.constant dense<0.000000e+00> : vector<8x256xf32>
    %22 = tpu.matmul %21, %19, %cst_14 {dimension_numbers = #tpu.dot_dimension_numbers<[1], [0], [0], [1], [0, 0, 1, 1], [], []>} : vector<8x8xbf16>, vector<8x256xbf16>, vector<8x256xf32> -> vector<8x256xf32>
    %23 = arith.addf %17, %22 : vector<8x256xf32>
    %24 = vector.extract_strided_slice %1 {offsets = [0, 2], sizes = [8, 256], strides = [1, 1]} : vector<8x384xf32> to vector<8x256xf32>
    %25 = arith.truncf %24 : vector<8x256xf32> to vector<8x256xbf16>
    %c2 = arith.constant 2 : index
    %c0_15 = arith.constant 0 : index
    %c0_16 = arith.constant 0 : index
    %26 = vector.load %arg3[%c2, %c0_15, %c0_16] : memref<9x8x8xbf16, #tpu.memory_space<vmem>>, vector<1x8x8xbf16>
    %27 = vector.shape_cast %26 : vector<1x8x8xbf16> to vector<8x8xbf16>
    %cst_17 = arith.constant dense<0.000000e+00> : vector<8x256xf32>
    %28 = tpu.matmul %27, %25, %cst_17 {dimension_numbers = #tpu.dot_dimension_numbers<[1], [0], [0], [1], [0, 0, 1, 1], [], []>} : vector<8x8xbf16>, vector<8x256xbf16>, vector<8x256xf32> -> vector<8x256xf32>
    %29 = arith.addf %23, %28 : vector<8x256xf32>
    %30 = vector.extract_strided_slice %1 {offsets = [0, 16], sizes = [8, 256], strides = [1, 1]} : vector<8x384xf32> to vector<8x256xf32>
    %31 = arith.truncf %30 : vector<8x256xf32> to vector<8x256xbf16>
    %c3 = arith.constant 3 : index
    %c0_18 = arith.constant 0 : index
    %c0_19 = arith.constant 0 : index
    %32 = vector.load %arg3[%c3, %c0_18, %c0_19] : memref<9x8x8xbf16, #tpu.memory_space<vmem>>, vector<1x8x8xbf16>
    %33 = vector.shape_cast %32 : vector<1x8x8xbf16> to vector<8x8xbf16>
    %cst_20 = arith.constant dense<0.000000e+00> : vector<8x256xf32>
    %34 = tpu.matmul %33, %31, %cst_20 {dimension_numbers = #tpu.dot_dimension_numbers<[1], [0], [0], [1], [0, 0, 1, 1], [], []>} : vector<8x8xbf16>, vector<8x256xbf16>, vector<8x256xf32> -> vector<8x256xf32>
    %35 = arith.addf %29, %34 : vector<8x256xf32>
    %36 = vector.extract_strided_slice %1 {offsets = [0, 17], sizes = [8, 256], strides = [1, 1]} : vector<8x384xf32> to vector<8x256xf32>
    %37 = arith.truncf %36 : vector<8x256xf32> to vector<8x256xbf16>
    %c4 = arith.constant 4 : index
    %c0_21 = arith.constant 0 : index
    %c0_22 = arith.constant 0 : index
    %38 = vector.load %arg3[%c4, %c0_21, %c0_22] : memref<9x8x8xbf16, #tpu.memory_space<vmem>>, vector<1x8x8xbf16>
    %39 = vector.shape_cast %38 : vector<1x8x8xbf16> to vector<8x8xbf16>
    %cst_23 = arith.constant dense<0.000000e+00> : vector<8x256xf32>
    %40 = tpu.matmul %39, %37, %cst_23 {dimension_numbers = #tpu.dot_dimension_numbers<[1], [0], [0], [1], [0, 0, 1, 1], [], []>} : vector<8x8xbf16>, vector<8x256xbf16>, vector<8x256xf32> -> vector<8x256xf32>
    %41 = arith.addf %35, %40 : vector<8x256xf32>
    %42 = vector.extract_strided_slice %1 {offsets = [0, 18], sizes = [8, 256], strides = [1, 1]} : vector<8x384xf32> to vector<8x256xf32>
    %43 = arith.truncf %42 : vector<8x256xf32> to vector<8x256xbf16>
    %c5 = arith.constant 5 : index
    %c0_24 = arith.constant 0 : index
    %c0_25 = arith.constant 0 : index
    %44 = vector.load %arg3[%c5, %c0_24, %c0_25] : memref<9x8x8xbf16, #tpu.memory_space<vmem>>, vector<1x8x8xbf16>
    %45 = vector.shape_cast %44 : vector<1x8x8xbf16> to vector<8x8xbf16>
    %cst_26 = arith.constant dense<0.000000e+00> : vector<8x256xf32>
    %46 = tpu.matmul %45, %43, %cst_26 {dimension_numbers = #tpu.dot_dimension_numbers<[1], [0], [0], [1], [0, 0, 1, 1], [], []>} : vector<8x8xbf16>, vector<8x256xbf16>, vector<8x256xf32> -> vector<8x256xf32>
    %47 = arith.addf %41, %46 : vector<8x256xf32>
    %48 = vector.extract_strided_slice %1 {offsets = [0, 32], sizes = [8, 256], strides = [1, 1]} : vector<8x384xf32> to vector<8x256xf32>
    %49 = arith.truncf %48 : vector<8x256xf32> to vector<8x256xbf16>
    %c6 = arith.constant 6 : index
    %c0_27 = arith.constant 0 : index
    %c0_28 = arith.constant 0 : index
    %50 = vector.load %arg3[%c6, %c0_27, %c0_28] : memref<9x8x8xbf16, #tpu.memory_space<vmem>>, vector<1x8x8xbf16>
    %51 = vector.shape_cast %50 : vector<1x8x8xbf16> to vector<8x8xbf16>
    %cst_29 = arith.constant dense<0.000000e+00> : vector<8x256xf32>
    %52 = tpu.matmul %51, %49, %cst_29 {dimension_numbers = #tpu.dot_dimension_numbers<[1], [0], [0], [1], [0, 0, 1, 1], [], []>} : vector<8x8xbf16>, vector<8x256xbf16>, vector<8x256xf32> -> vector<8x256xf32>
    %53 = arith.addf %47, %52 : vector<8x256xf32>
    %54 = vector.extract_strided_slice %1 {offsets = [0, 33], sizes = [8, 256], strides = [1, 1]} : vector<8x384xf32> to vector<8x256xf32>
    %55 = arith.truncf %54 : vector<8x256xf32> to vector<8x256xbf16>
    %c7 = arith.constant 7 : index
    %c0_30 = arith.constant 0 : index
    %c0_31 = arith.constant 0 : index
    %56 = vector.load %arg3[%c7, %c0_30, %c0_31] : memref<9x8x8xbf16, #tpu.memory_space<vmem>>, vector<1x8x8xbf16>
    %57 = vector.shape_cast %56 : vector<1x8x8xbf16> to vector<8x8xbf16>
    %cst_32 = arith.constant dense<0.000000e+00> : vector<8x256xf32>
    %58 = tpu.matmul %57, %55, %cst_32 {dimension_numbers = #tpu.dot_dimension_numbers<[1], [0], [0], [1], [0, 0, 1, 1], [], []>} : vector<8x8xbf16>, vector<8x256xbf16>, vector<8x256xf32> -> vector<8x256xf32>
    %59 = arith.addf %53, %58 : vector<8x256xf32>
    %60 = vector.extract_strided_slice %1 {offsets = [0, 34], sizes = [8, 256], strides = [1, 1]} : vector<8x384xf32> to vector<8x256xf32>
    %61 = arith.truncf %60 : vector<8x256xf32> to vector<8x256xbf16>
    %c8 = arith.constant 8 : index
    %c0_33 = arith.constant 0 : index
    %c0_34 = arith.constant 0 : index
    %62 = vector.load %arg3[%c8, %c0_33, %c0_34] : memref<9x8x8xbf16, #tpu.memory_space<vmem>>, vector<1x8x8xbf16>
    %63 = vector.shape_cast %62 : vector<1x8x8xbf16> to vector<8x8xbf16>
    %cst_35 = arith.constant dense<0.000000e+00> : vector<8x256xf32>
    %64 = tpu.matmul %63, %61, %cst_35 {dimension_numbers = #tpu.dot_dimension_numbers<[1], [0], [0], [1], [0, 0, 1, 1], [], []>} : vector<8x8xbf16>, vector<8x256xbf16>, vector<8x256xf32> -> vector<8x256xf32>
    %65 = arith.addf %59, %64 : vector<8x256xf32>
    %66 = vector.broadcast %10 : vector<8x1xf32> to vector<8x256xf32>
    %67 = arith.addf %65, %66 : vector<8x256xf32>
    %cst_36 = arith.constant 0.000000e+00 : f32
    %68 = vector.broadcast %cst_36 : f32 to vector<8x256xf32>
    %69 = arith.maximumf %67, %68 : vector<8x256xf32>
    %cst_37 = arith.constant 0.000000e+00 : f32
    %70 = vector.broadcast %cst_37 : f32 to vector<8x256xf32>
    %71 = vector.extract_strided_slice %3 {offsets = [0, 0], sizes = [8, 256], strides = [1, 1]} : vector<8x384xf32> to vector<8x256xf32>
    %72 = arith.truncf %71 : vector<8x256xf32> to vector<8x256xbf16>
    %c0_38 = arith.constant 0 : index
    %c0_39 = arith.constant 0 : index
    %c0_40 = arith.constant 0 : index
    %73 = vector.load %arg3[%c0_38, %c0_39, %c0_40] : memref<9x8x8xbf16, #tpu.memory_space<vmem>>, vector<1x8x8xbf16>
    %74 = vector.shape_cast %73 : vector<1x8x8xbf16> to vector<8x8xbf16>
    %cst_41 = arith.constant dense<0.000000e+00> : vector<8x256xf32>
    %75 = tpu.matmul %74, %72, %cst_41 {dimension_numbers = #tpu.dot_dimension_numbers<[1], [0], [0], [1], [0, 0, 1, 1], [], []>} : vector<8x8xbf16>, vector<8x256xbf16>, vector<8x256xf32> -> vector<8x256xf32>
    %76 = arith.addf %70, %75 : vector<8x256xf32>
    %77 = vector.extract_strided_slice %3 {offsets = [0, 1], sizes = [8, 256], strides = [1, 1]} : vector<8x384xf32> to vector<8x256xf32>
    %78 = arith.truncf %77 : vector<8x256xf32> to vector<8x256xbf16>
    %c1_42 = arith.constant 1 : index
    %c0_43 = arith.constant 0 : index
    %c0_44 = arith.constant 0 : index
    %79 = vector.load %arg3[%c1_42, %c0_43, %c0_44] : memref<9x8x8xbf16, #tpu.memory_space<vmem>>, vector<1x8x8xbf16>
    %80 = vector.shape_cast %79 : vector<1x8x8xbf16> to vector<8x8xbf16>
    %cst_45 = arith.constant dense<0.000000e+00> : vector<8x256xf32>
    %81 = tpu.matmul %80, %78, %cst_45 {dimension_numbers = #tpu.dot_dimension_numbers<[1], [0], [0], [1], [0, 0, 1, 1], [], []>} : vector<8x8xbf16>, vector<8x256xbf16>, vector<8x256xf32> -> vector<8x256xf32>
    %82 = arith.addf %76, %81 : vector<8x256xf32>
    %83 = vector.extract_strided_slice %3 {offsets = [0, 2], sizes = [8, 256], strides = [1, 1]} : vector<8x384xf32> to vector<8x256xf32>
    %84 = arith.truncf %83 : vector<8x256xf32> to vector<8x256xbf16>
    %c2_46 = arith.constant 2 : index
    %c0_47 = arith.constant 0 : index
    %c0_48 = arith.constant 0 : index
    %85 = vector.load %arg3[%c2_46, %c0_47, %c0_48] : memref<9x8x8xbf16, #tpu.memory_space<vmem>>, vector<1x8x8xbf16>
    %86 = vector.shape_cast %85 : vector<1x8x8xbf16> to vector<8x8xbf16>
    %cst_49 = arith.constant dense<0.000000e+00> : vector<8x256xf32>
    %87 = tpu.matmul %86, %84, %cst_49 {dimension_numbers = #tpu.dot_dimension_numbers<[1], [0], [0], [1], [0, 0, 1, 1], [], []>} : vector<8x8xbf16>, vector<8x256xbf16>, vector<8x256xf32> -> vector<8x256xf32>
    %88 = arith.addf %82, %87 : vector<8x256xf32>
    %89 = vector.extract_strided_slice %3 {offsets = [0, 16], sizes = [8, 256], strides = [1, 1]} : vector<8x384xf32> to vector<8x256xf32>
    %90 = arith.truncf %89 : vector<8x256xf32> to vector<8x256xbf16>
    %c3_50 = arith.constant 3 : index
    %c0_51 = arith.constant 0 : index
    %c0_52 = arith.constant 0 : index
    %91 = vector.load %arg3[%c3_50, %c0_51, %c0_52] : memref<9x8x8xbf16, #tpu.memory_space<vmem>>, vector<1x8x8xbf16>
    %92 = vector.shape_cast %91 : vector<1x8x8xbf16> to vector<8x8xbf16>
    %cst_53 = arith.constant dense<0.000000e+00> : vector<8x256xf32>
    %93 = tpu.matmul %92, %90, %cst_53 {dimension_numbers = #tpu.dot_dimension_numbers<[1], [0], [0], [1], [0, 0, 1, 1], [], []>} : vector<8x8xbf16>, vector<8x256xbf16>, vector<8x256xf32> -> vector<8x256xf32>
    %94 = arith.addf %88, %93 : vector<8x256xf32>
    %95 = vector.extract_strided_slice %3 {offsets = [0, 17], sizes = [8, 256], strides = [1, 1]} : vector<8x384xf32> to vector<8x256xf32>
    %96 = arith.truncf %95 : vector<8x256xf32> to vector<8x256xbf16>
    %c4_54 = arith.constant 4 : index
    %c0_55 = arith.constant 0 : index
    %c0_56 = arith.constant 0 : index
    %97 = vector.load %arg3[%c4_54, %c0_55, %c0_56] : memref<9x8x8xbf16, #tpu.memory_space<vmem>>, vector<1x8x8xbf16>
    %98 = vector.shape_cast %97 : vector<1x8x8xbf16> to vector<8x8xbf16>
    %cst_57 = arith.constant dense<0.000000e+00> : vector<8x256xf32>
    %99 = tpu.matmul %98, %96, %cst_57 {dimension_numbers = #tpu.dot_dimension_numbers<[1], [0], [0], [1], [0, 0, 1, 1], [], []>} : vector<8x8xbf16>, vector<8x256xbf16>, vector<8x256xf32> -> vector<8x256xf32>
    %100 = arith.addf %94, %99 : vector<8x256xf32>
    %101 = vector.extract_strided_slice %3 {offsets = [0, 18], sizes = [8, 256], strides = [1, 1]} : vector<8x384xf32> to vector<8x256xf32>
    %102 = arith.truncf %101 : vector<8x256xf32> to vector<8x256xbf16>
    %c5_58 = arith.constant 5 : index
    %c0_59 = arith.constant 0 : index
    %c0_60 = arith.constant 0 : index
    %103 = vector.load %arg3[%c5_58, %c0_59, %c0_60] : memref<9x8x8xbf16, #tpu.memory_space<vmem>>, vector<1x8x8xbf16>
    %104 = vector.shape_cast %103 : vector<1x8x8xbf16> to vector<8x8xbf16>
    %cst_61 = arith.constant dense<0.000000e+00> : vector<8x256xf32>
    %105 = tpu.matmul %104, %102, %cst_61 {dimension_numbers = #tpu.dot_dimension_numbers<[1], [0], [0], [1], [0, 0, 1, 1], [], []>} : vector<8x8xbf16>, vector<8x256xbf16>, vector<8x256xf32> -> vector<8x256xf32>
    %106 = arith.addf %100, %105 : vector<8x256xf32>
    %107 = vector.extract_strided_slice %3 {offsets = [0, 32], sizes = [8, 256], strides = [1, 1]} : vector<8x384xf32> to vector<8x256xf32>
    %108 = arith.truncf %107 : vector<8x256xf32> to vector<8x256xbf16>
    %c6_62 = arith.constant 6 : index
    %c0_63 = arith.constant 0 : index
    %c0_64 = arith.constant 0 : index
    %109 = vector.load %arg3[%c6_62, %c0_63, %c0_64] : memref<9x8x8xbf16, #tpu.memory_space<vmem>>, vector<1x8x8xbf16>
    %110 = vector.shape_cast %109 : vector<1x8x8xbf16> to vector<8x8xbf16>
    %cst_65 = arith.constant dense<0.000000e+00> : vector<8x256xf32>
    %111 = tpu.matmul %110, %108, %cst_65 {dimension_numbers = #tpu.dot_dimension_numbers<[1], [0], [0], [1], [0, 0, 1, 1], [], []>} : vector<8x8xbf16>, vector<8x256xbf16>, vector<8x256xf32> -> vector<8x256xf32>
    %112 = arith.addf %106, %111 : vector<8x256xf32>
    %113 = vector.extract_strided_slice %3 {offsets = [0, 33], sizes = [8, 256], strides = [1, 1]} : vector<8x384xf32> to vector<8x256xf32>
    %114 = arith.truncf %113 : vector<8x256xf32> to vector<8x256xbf16>
    %c7_66 = arith.constant 7 : index
    %c0_67 = arith.constant 0 : index
    %c0_68 = arith.constant 0 : index
    %115 = vector.load %arg3[%c7_66, %c0_67, %c0_68] : memref<9x8x8xbf16, #tpu.memory_space<vmem>>, vector<1x8x8xbf16>
    %116 = vector.shape_cast %115 : vector<1x8x8xbf16> to vector<8x8xbf16>
    %cst_69 = arith.constant dense<0.000000e+00> : vector<8x256xf32>
    %117 = tpu.matmul %116, %114, %cst_69 {dimension_numbers = #tpu.dot_dimension_numbers<[1], [0], [0], [1], [0, 0, 1, 1], [], []>} : vector<8x8xbf16>, vector<8x256xbf16>, vector<8x256xf32> -> vector<8x256xf32>
    %118 = arith.addf %112, %117 : vector<8x256xf32>
    %119 = vector.extract_strided_slice %3 {offsets = [0, 34], sizes = [8, 256], strides = [1, 1]} : vector<8x384xf32> to vector<8x256xf32>
    %120 = arith.truncf %119 : vector<8x256xf32> to vector<8x256xbf16>
    %c8_70 = arith.constant 8 : index
    %c0_71 = arith.constant 0 : index
    %c0_72 = arith.constant 0 : index
    %121 = vector.load %arg3[%c8_70, %c0_71, %c0_72] : memref<9x8x8xbf16, #tpu.memory_space<vmem>>, vector<1x8x8xbf16>
    %122 = vector.shape_cast %121 : vector<1x8x8xbf16> to vector<8x8xbf16>
    %cst_73 = arith.constant dense<0.000000e+00> : vector<8x256xf32>
    %123 = tpu.matmul %122, %120, %cst_73 {dimension_numbers = #tpu.dot_dimension_numbers<[1], [0], [0], [1], [0, 0, 1, 1], [], []>} : vector<8x8xbf16>, vector<8x256xbf16>, vector<8x256xf32> -> vector<8x256xf32>
    %124 = arith.addf %118, %123 : vector<8x256xf32>
    %125 = vector.broadcast %10 : vector<8x1xf32> to vector<8x256xf32>
    %126 = arith.addf %124, %125 : vector<8x256xf32>
    %cst_74 = arith.constant 0.000000e+00 : f32
    %127 = vector.broadcast %cst_74 : f32 to vector<8x256xf32>
    %128 = arith.maximumf %126, %127 : vector<8x256xf32>
    %129 = arith.subf %69, %128 : vector<8x256xf32>
    %c0_75 = arith.constant 0 : index
    %c0_76 = arith.constant 0 : index
    %130 = vector.load %arg5[%c0_75, %c0_76] : memref<1x256xf32, #tpu.memory_space<vmem>>, vector<1x256xf32>
    %131 = vector.broadcast %130 : vector<1x256xf32> to vector<8x256xf32>
    %132 = arith.mulf %129, %131 : vector<8x256xf32>
    %133 = arith.mulf %132, %132 : vector<8x256xf32>
    %134 = vector.shape_cast %133 : vector<8x256xf32> to vector<1x8x256xf32>
    %cst_77 = arith.constant dense<0.000000e+00> : vector<1xf32>
    %135 = vector.multi_reduction <add>, %134, %cst_77 [1, 2] : vector<1x8x256xf32> to vector<1xf32>
    %136 = vector.shape_cast %135 : vector<1xf32> to vector<1x1x1xf32>
    %137 = vector.extract %136[0, 0, 0] : f32 from vector<1x1x1xf32>
    %cst_78 = arith.constant 4.8828125E-4 : f32
    %138 = arith.mulf %9, %cst_78 : f32
    %cst_79 = arith.constant 3.18877544E-4 : f32
    %139 = arith.mulf %137, %cst_79 : f32
    %140 = arith.addf %138, %139 : f32
    %141 = vector.broadcast %140 : f32 to vector<1x8x128xf32>
    %c0_80 = arith.constant 0 : index
    %c0_81 = arith.constant 0 : index
    %c0_82 = arith.constant 0 : index
    %142 = vector.load %arg6[%c0_80, %c0_81, %c0_82] : memref<1x8x128xf32, #tpu.memory_space<vmem>>, vector<1x8x128xf32>
    tpu.vector_store %arg6[%c0_80, %c0_81, %c0_82], %141 {strides = array<i32>} : memref<1x8x128xf32, #tpu.memory_space<vmem>>, vector<1x8x128xf32>,
    return
  }
  func.func @transform_0(%arg0: i32) -> (i32, i32, i32) {
    %c0_i32 = arith.constant 0 : i32
    %c0_i32_0 = arith.constant 0 : i32
    %c0_i32_1 = arith.constant 0 : i32
    return %arg0, %c0_i32, %c0_i32_0 : i32, i32, i32
  }
  func.func @transform_1(%arg0: i32) -> (i32, i32, i32) {
    %c0_i32 = arith.constant 0 : i32
    %c0_i32_0 = arith.constant 0 : i32
    %c0_i32_1 = arith.constant 0 : i32
    return %arg0, %c0_i32, %c0_i32_0 : i32, i32, i32
  }
  func.func @transform_2(%arg0: i32) -> (i32, i32, i32) {
    %c0_i32 = arith.constant 0 : i32
    %c0_i32_0 = arith.constant 0 : i32
    %c0_i32_1 = arith.constant 0 : i32
    %c0_i32_2 = arith.constant 0 : i32
    return %c0_i32, %c0_i32_0, %c0_i32_1 : i32, i32, i32
  }
  func.func @transform_3(%arg0: i32) -> (i32, i32) {
    %c0_i32 = arith.constant 0 : i32
    %c0_i32_0 = arith.constant 0 : i32
    %c0_i32_1 = arith.constant 0 : i32
    return %c0_i32, %c0_i32_0 : i32, i32
  }
  func.func @transform_4(%arg0: i32) -> (i32, i32) {
    %c0_i32 = arith.constant 0 : i32
    %c0_i32_0 = arith.constant 0 : i32
    %c0_i32_1 = arith.constant 0 : i32
    return %c0_i32, %c0_i32_0 : i32, i32
  }
  func.func @transform_5(%arg0: i32) -> (i32, i32, i32) {
    %c0_i32 = arith.constant 0 : i32
    %c0_i32_0 = arith.constant 0 : i32
    %c0_i32_1 = arith.constant 0 : i32
    return %arg0, %c0_i32, %c0_i32_0 : i32, i32, i32
  }
}

</mosaic_0001>

<bundles_post_ra>
// kernel: perceptual_loss.1
= control target key start
LH: loop header
LB: loop body
LE: loop exit
PB: predicated region body
PF: predicated region fallthrough
CT: control target
= control target key end

     0   :  { %s1571_s18 = smov 0   ;;  %s1873_s0 = inlined_call_operand.vmem [shape: f32[2,8,384], index: 0, kind: input, shape index: {}]   ;;  %s1874_s1 = inlined_call_operand.vmem [shape: f32[2,8,384], index: 1, kind: input, shape index: {}]   ;;  %s1875_s2 = inlined_call_operand.vmem [shape: bf16[9,8,8], index: 2, kind: input, shape index: {}]   ;;  %s1876_s3 = inlined_call_operand.vmem [shape: f32[8,1], index: 3, kind: input, shape index: {}]   ;;  %s1877_s4 = inlined_call_operand.vmem [shape: f32[1,256], index: 4, kind: input, shape index: {}]   ;;  %s1878_s5 = inlined_call_operand.vmem [shape: f32[2,8,128], index: 5, kind: output, shape index: {}]  }
   0x1 LB: > { %s1447_s19 = sadd.s32 4294967295, %s1530_s18   ;;  %p1451_p0 = scmp.ge.s32.totalorder %s1530_s18, 1  ;;  %s1530_s18 = sphi %s1571_s18, %s15_s18  }
   0x2   : > { %p197_p1 = scmp.lt.s32.totalorder %s1530_s18, 3 }
   0x4   : > { %p198_p2 = pnand %p1451_p0, %p197_p1 }
   0x5   : > { %p229_p3 = scmp.lt.s32.totalorder (!%p198_p2), %s1447_s19, 1  ;;  %v1532_v0 = vmov (!%p198_p2), 0   ;;  %vm290_vm0 = vcmask (!%p198_p2), 1043456   ;;  %s1533_s24 = smov (!%p198_p2), 127   ;;  %vm286_vm1 = vcmask (!%p198_p2), 64512   ;;  %v267_v15 = vld [vmem:[%s1876_s3] sm:$0xff] (!%p198_p2) }
   0x6   : > { %201 = sbr.rel (%p198_p2) target bundleno = 669 (0x29d), region = 40  ;;  %329 = vmatprep.mubr.bf16.mxu0 (!%p198_p2), %v1532_v0  ;;  %379 = vmatprep.mubr.bf16.mxu1 (!%p198_p2), %v1532_v0  ;;  %s1534_s25 = smov (!%p198_p2), 126   ;;  %v1611_v8 = vld [vmem:[%s1875_s2] sm:$0xf] (!%p198_p2)  ;;  %vm283_vm2 = vcmask (!%p198_p2), 1039360   ;;  %vm396_vm3 = vcmask (!%p198_p2), 1031168  }
   0x7   : > { %1523 = vset.pattern.permute.xlu0 (!%p198_p2), %v1532_v0  ;;  %s1535_s28 = smov (!%p198_p2), 112   ;;  %s1536_s29 = smov (!%p198_p2), 111   ;;  %v1707_v23 = vld [vmem:[%s1875_s2 + $0x4] sm:$0xf] (!%p198_p2)  ;;  %vm459_vm4 = vcmask (!%p198_p2), 916480   ;;  %vm522_vm5 = vcmask (!%p198_p2), 908288  }
   0x8   : > { %s1537_s30 = smov (!%p198_p2), 110   ;;  %s1538_s6 = smov (!%p198_p2), 96   ;;  %v1720_v32 = vld [vmem:[%s1875_s2 + $0x8] sm:$0xf] (!%p198_p2)  ;;  %v1730_v37 = vld [vmem:[%s1875_s2 + $0xc] sm:$0xf] (!%p198_p2) }
   0x9   : > { %s1539_s7 = smov (!%p198_p2), 95   ;;  %s1540_s11 = smov (!%p198_p2), 94   ;;  %v1742_v43 = vld [vmem:[%s1875_s2 + $0x10] sm:$0xf] (!%p198_p2)  ;;  %vm585_vm6 = vcmask (!%p198_p2), 900096   ;;  %vm648_vm7 = vcmask (!%p198_p2), 785408  }
   0xa   : > { %v1755_v51 = vld [vmem:[%s1875_s2 + $0x14] sm:$0xf] (!%p198_p2)  ;;  %v1766_v57 = vld [vmem:[%s1875_s2 + $0x18] sm:$0xf] (!%p198_p2)  ;;  %vm711_vm8 = vcmask (!%p198_p2), 777216   ;;  %vm774_vm9 = vcmask (!%p198_p2), 769024  }
   0xd   : > { %s1880_s19 = smov (!%p229_p3, %s1447_s19), 1 }
   0xe   : > { %s1501_s20 = smul.u32 24, %s1880_s19 }
  0x10   : > { %s233_s23 = scalar_lea.vmem %s1873_s0, %s1501_s20  ;;  %s238_s10 = scalar_lea.vmem %s1874_s1, %s1501_s20 }
  0x11   : > { %v1589_v1 = vld [vmem:[%s233_s23 + $0x10] sm:$0xff]  ;;  %v1591_v2 = vld [vmem:[%s233_s23] sm:$0xff]  ;;  %v1593_v3 = vld [vmem:[%s233_s23 + $0x8] sm:$0xff] }
  0x12   : > { %v271_v4 = vpack.c.bf16 %v1589_v1, %v1589_v1  ;;  %v268_v5 = vpack.c.bf16 %v1591_v2, %v1591_v2  ;;  %v269_v6 = vpack.c.bf16 %v1593_v3, %v1593_v3  ;;  %v1639_v9 = vld [vmem:[%s238_s10 + $0x8] sm:$0xff]  ;;  %v1641_v10 = vld [vmem:[%s238_s10] sm:$0xff]  ;;  %v1653_v13 = vld [vmem:[%s238_s10 + $0x10] sm:$0xff]  ;;  %s1454_s10 = sshll.u32 %s1880_s19, 3 }
  0x13   : > { %v1647_v11 = vpack.c.bf16 %v1639_v9, %v1639_v9  ;;  %v1651_v12 = vpack.c.bf16 %v1641_v10, %v1641_v10  ;;  %v840_v14 = vpack.c.bf16 %v1653_v13, %v1653_v13  ;;  %s242_s16 = scalar_lea.vmem %s1878_s5, %s1454_s10 }
  0x14   : > { %281 = vrot.lane.b32.xlu1 %v271_v4, %s1533_s24  ;;  %277 = vrot.lane.b32.xlu0 %v268_v5, %s1533_s24  ;;  %v342_v7 = vsel %vm290_vm0, %v268_v5, 0 }
  0x15   : > { %1458 = vmatprep.subr.msk.bf16.mxu1 %vm290_vm0, %v269_v6 }
  0x16   : > { %348 = vmatpush1.bf16.msra.mxu1 %v342_v7 }
  0x18   : > { %390 = vrot.lane.b32.xlu1 %v268_v5, %s1534_s25  ;;  %279 = vrot.lane.b32.xlu0 %v269_v6, %s1533_s24 }
  0x19   : > { %1459 = vmatmul.mubr.msk.bf16.vlgmr.msra.gmra.mrb[0].mxu1 %vm286_vm1, %v1611_v8 }
  0x1a   : > { %503 = vmatprep.mubr.bf16.mxu1 %v1532_v0 }
  0x1c   : > { %394 = vrot.lane.b32.xlu1 %v271_v4, %s1534_s25  ;;  %392 = vrot.lane.b32.xlu0 %v269_v6, %s1534_s25 }
  0x20   : > { %455 = vrot.lane.b32.xlu1 %v269_v6, %s1535_s28  ;;  %453 = vrot.lane.b32.xlu0 %v268_v5, %s1535_s28 }
  0x24   : > { %516 = vrot.lane.b32.xlu1 %v268_v5, %s1536_s29  ;;  %457 = vrot.lane.b32.xlu0 %v271_v4, %s1535_s28 }
  0x28   : > { %520 = vrot.lane.b32.xlu1 %v271_v4, %s1536_s29  ;;  %518 = vrot.lane.b32.xlu0 %v269_v6, %s1536_s29 }
  0x2c   : > { %581 = vrot.lane.b32.xlu1 %v269_v6, %s1537_s30  ;;  %579 = vrot.lane.b32.xlu0 %v268_v5, %s1537_s30 }
  0x30   : > { %642 = vrot.lane.b32.xlu1 %v268_v5, %s1538_s6  ;;  %583 = vrot.lane.b32.xlu0 %v271_v4, %s1537_s30 }
  0x34   : > { %646 = vrot.lane.b32.xlu1 %v271_v4, %s1538_s6  ;;  %644 = vrot.lane.b32.xlu0 %v269_v6, %s1538_s6 }
  0x38   : > { %707 = vrot.lane.b32.xlu1 %v269_v6, %s1539_s7  ;;  %705 = vrot.lane.b32.xlu0 %v268_v5, %s1539_s7 }
  0x3c   : > { %768 = vrot.lane.b32.xlu1 %v268_v5, %s1540_s11  ;;  %709 = vrot.lane.b32.xlu0 %v271_v4, %s1539_s7  ;;  %v1779_v5 = vld [vmem:[%s1875_s2 + $0x1c] sm:$0xf] }
  0x40   : > { %772 = vrot.lane.b32.xlu1 %v271_v4, %s1540_s11  ;;  %770 = vrot.lane.b32.xlu0 %v269_v6, %s1540_s11 }
  0x44   : > { %846 = vrot.lane.b32.xlu1 %v1647_v11, %s1533_s24  ;;  %844 = vrot.lane.b32.xlu0 %v1651_v12, %s1533_s24 }
  0x48   : > { %946 = vrot.lane.b32.xlu1 %v1651_v12, %s1534_s25  ;;  %848 = vrot.lane.b32.xlu0 %v840_v14, %s1533_s24 }
  0x4c   : > { %950 = vrot.lane.b32.xlu1 %v840_v14, %s1534_s25  ;;  %948 = vrot.lane.b32.xlu0 %v1647_v11, %s1534_s25 }
  0x50   : > { %1005 = vrot.lane.b32.xlu1 %v1647_v11, %s1535_s28  ;;  %1003 = vrot.lane.b32.xlu0 %v1651_v12, %s1535_s28 }
  0x54   : > { %1060 = vrot.lane.b32.xlu1 %v1651_v12, %s1536_s29  ;;  %1007 = vrot.lane.b32.xlu0 %v840_v14, %s1535_s28 }
  0x58   : > { %1064 = vrot.lane.b32.xlu1 %v840_v14, %s1536_s29  ;;  %1062 = vrot.lane.b32.xlu0 %v1647_v11, %s1536_s29 }
  0x5c   : > { %1119 = vrot.lane.b32.xlu1 %v1647_v11, %s1537_s30  ;;  %1117 = vrot.lane.b32.xlu0 %v1651_v12, %s1537_s30 }
  0x60   : > { %1174 = vrot.lane.b32.xlu1 %v1651_v12, %s1538_s6  ;;  %1121 = vrot.lane.b32.xlu0 %v840_v14, %s1537_s30 }
  0x64   : > { %1178 = vrot.lane.b32.xlu1 %v840_v14, %s1538_s6  ;;  %1176 = vrot.lane.b32.xlu0 %v1647_v11, %s1538_s6 }
  0x68   : > { %1233 = vrot.lane.b32.xlu1 %v1647_v11, %s1539_s7  ;;  %1231 = vrot.lane.b32.xlu0 %v1651_v12, %s1539_s7 }
  0x6c   : > { %1288 = vrot.lane.b32.xlu1 %v1651_v12, %s1540_s11  ;;  %1235 = vrot.lane.b32.xlu0 %v840_v14, %s1539_s7 }
  0x70   : > { %1292 = vrot.lane.b32.xlu1 %v840_v14, %s1540_s11  ;;  %1290 = vrot.lane.b32.xlu0 %v1647_v11, %s1540_s11 }
  0x74   : > { %831 = vperm.xlu0 %1523, %v267_v15  }
  0x86   : > { %v282_v16 = vpop.permute.xlu1 %281  ;;  %v278_v17 = vpop.permute.xlu0 %277 }
  0x8a   : > { %v391_v18 = vpop.permute.xlu1 %390  ;;  %v280_v19 = vpop.permute.xlu0 %279 }
  0x8b   : > { %v285_v20 = vsel %vm283_vm2, %v280_v19, %v282_v16  ;;  %v284_v21 = vsel %vm283_vm2, %v278_v17, %v280_v19  ;;  %v1790_v17 = vld [vmem:[%s1875_s2 + $0x20] sm:$0xf] }
  0x8c   : > { %1456 = vmatprep.subr.msk.bf16.mxu0 %vm290_vm0, %v285_v20  ;;  %v292_v22 = vsel %vm290_vm0, %v284_v21, 0  ;;  %v900_v20 = vsel %vm290_vm0, %v1651_v12, 0 }
  0x8d   : > { %298 = vmatpush1.bf16.msra.mxu0 %v292_v22 }
  0x8e   : > { %v395_v24 = vpop.permute.xlu1 %394  ;;  %v393_v25 = vpop.permute.xlu0 %392 }
  0x8f   : > { %v397_v26 = vsel %vm396_vm3, %v391_v18, %v393_v25  ;;  %v398_v27 = vsel %vm396_vm3, %v393_v25, %v395_v24 }
  0x90   : > { %v403_v28 = vsel %vm290_vm0, %v397_v26, 0  ;;  %1461 = vmatprep.subr.msk.bf16.mxu0 %vm290_vm0, %v398_v27  ;;  %1457 = vmatmul.mubr.msk.bf16.vlgmr.msra.gmra.mrb[0].mxu0 %vm286_vm1, %v1707_v23 }
  0x91   : > { %409 = vmatpush1.bf16.msra.mxu0 %v403_v28  ;;  %440 = vmatprep.mubr.bf16.mxu0 %v1532_v0 }
  0x92   : > { %v456_v29 = vpop.permute.xlu1 %455  ;;  %v454_v30 = vpop.permute.xlu0 %453 }
  0x93   : > { %v460_v31 = vsel %vm459_vm4, %v454_v30, %v456_v29 }
  0x94   : > { %v466_v36 = vsel %vm290_vm0, %v460_v31, 0 }
  0x96   : > { %v517_v33 = vpop.permute.xlu1 %516  ;;  %v458_v34 = vpop.permute.xlu0 %457 }
  0x97   : > { %v461_v35 = vsel %vm459_vm4, %v456_v29, %v458_v34 }
  0x98   : > { %1464 = vmatprep.subr.msk.bf16.mxu1 %vm290_vm0, %v461_v35  ;;  %1462 = vmatmul.mubr.msk.bf16.vlgmr.msra.gmra.mrb[4].mxu0 %vm286_vm1, %v1720_v32 }
  0x99   : > { %472 = vmatpush1.bf16.msra.mxu1 %v466_v36  ;;  %566 = vmatprep.mubr.bf16.mxu0 %v1532_v0 }
  0x9a   : > { %v521_v38 = vpop.permute.xlu1 %520  ;;  %v519_v39 = vpop.permute.xlu0 %518 }
  0x9b   : > { %v523_v40 = vsel %vm522_vm5, %v517_v33, %v519_v39  ;;  %v524_v41 = vsel %vm522_vm5, %v519_v39, %v521_v38 }
  0x9c   : > { %v529_v42 = vsel %vm290_vm0, %v523_v40, 0  ;;  %1467 = vmatprep.subr.msk.bf16.mxu0 %vm290_vm0, %v524_v41  ;;  %1465 = vmatmul.mubr.msk.bf16.vlgmr.msra.gmra.mrb[4].mxu1 %vm286_vm1, %v1730_v37 }
  0x9d   : > { %535 = vmatpush1.bf16.msra.mxu0 %v529_v42  ;;  %629 = vmatprep.mubr.bf16.mxu1 %v1532_v0 }
  0x9e   : > { %v582_v44 = vpop.permute.xlu1 %581  ;;  %v580_v45 = vpop.permute.xlu0 %579 }
  0x9f   : > { %v586_v46 = vsel %vm585_vm6, %v580_v45, %v582_v44 }
  0xa0   : > { %1468 = vmatmul.mubr.msk.bf16.vlgmr.msra.gmra.mrb[8].mxu0 %vm286_vm1, %v1742_v43  ;;  %v592_v50 = vsel %vm290_vm0, %v586_v46, 0 }
  0xa1   : > { %692 = vmatprep.mubr.bf16.mxu0 %v1532_v0 }
  0xa2   : > { %v643_v47 = vpop.permute.xlu1 %642  ;;  %v584_v48 = vpop.permute.xlu0 %583 }
  0xa3   : > { %v587_v49 = vsel %vm585_vm6, %v582_v44, %v584_v48 }
  0xa4   : > { %1470 = vmatprep.subr.msk.bf16.mxu1 %vm290_vm0, %v587_v49 }
  0xa5   : > { %598 = vmatpush1.bf16.msra.mxu1 %v592_v50 }
  0xa6   : > { %v647_v52 = vpop.permute.xlu1 %646  ;;  %v645_v53 = vpop.permute.xlu0 %644 }
  0xa7   : > { %v649_v54 = vsel %vm648_vm7, %v643_v47, %v645_v53  ;;  %v650_v55 = vsel %vm648_vm7, %v645_v53, %v647_v52 }
  0xa8   : > { %v655_v56 = vsel %vm290_vm0, %v649_v54, 0  ;;  %1473 = vmatprep.subr.msk.bf16.mxu0 %vm290_vm0, %v650_v55  ;;  %1471 = vmatmul.mubr.msk.bf16.vlgmr.msra.gmra.mrb[8].mxu1 %vm286_vm1, %v1755_v51 }
  0xa9   : > { %661 = vmatpush1.bf16.msra.mxu0 %v655_v56  ;;  %755 = vmatprep.mubr.bf16.mxu1 %v1532_v0 }
  0xaa   : > { %v708_v58 = vpop.permute.xlu1 %707  ;;  %v706_v59 = vpop.permute.xlu0 %705 }
  0xab   : > { %v712_v60 = vsel %vm711_vm8, %v706_v59, %v708_v58 }
  0xac   : > { %1474 = vmatmul.mubr.msk.bf16.vlgmr.msra.gmra.mrb[12].mxu0 %vm286_vm1, %v1766_v57  ;;  %v718_v4 = vsel %vm290_vm0, %v712_v60, 0 }
  0xad   : > { %818 = vmatprep.mubr.bf16.mxu0 %v1532_v0 }
  0xae   : > { %v769_v61 = vpop.permute.xlu1 %768  ;;  %v710_v62 = vpop.permute.xlu0 %709 }
  0xaf   : > { %v713_v63 = vsel %vm711_vm8, %v708_v58, %v710_v62 }
  0xb0   : > { %1476 = vmatprep.subr.msk.bf16.mxu1 %vm290_vm0, %v713_v63 }
  0xb1   : > { %724 = vmatpush1.bf16.msra.mxu1 %v718_v4 }
  0xb2   : > { %v773_v6 = vpop.permute.xlu1 %772  ;;  %v771_v7 = vpop.permute.xlu0 %770 }
  0xb3   : > { %v775_v14 = vsel %vm774_vm9, %v769_v61, %v771_v7  ;;  %v776_v15 = vsel %vm774_vm9, %v771_v7, %v773_v6 }
  0xb4   : > { %v781_v16 = vsel %vm290_vm0, %v775_v14, 0  ;;  %1479 = vmatprep.subr.msk.bf16.mxu0 %vm290_vm0, %v776_v15  ;;  %1477 = vmatmul.mubr.msk.bf16.vlgmr.msra.gmra.mrb[12].mxu1 %vm286_vm1, %v1779_v5  ;;  %v250_v14 = vsub.f32 %v1591_v2, %v1641_v10  ;;  %v251_v15 = vsub.f32 %v1593_v3, %v1639_v9 }
  0xb5   : > { %787 = vmatpush1.bf16.msra.mxu0 %v781_v16  ;;  %890 = vmatprep.mubr.bf16.mxu1 %v1532_v0  ;;  %v252_v16 = vsub.f32 %v1589_v1, %v1653_v13 }
  0xb6   : > { %v847_v18 = vpop.permute.xlu1 %846  ;;  %v845_v19 = vpop.permute.xlu0 %844  ;;  %1483 = vmatprep.subr.msk.bf16.mxu0 %vm290_vm0, %v1647_v11 }
  0xb7   : > { %v850_v21 = vsel %vm283_vm2, %v845_v19, %v847_v18  ;;  %v255_v19 = vmul.f32 %v252_v16, %v252_v16 }
  0xb8   : > { %1480 = vmatmul.mubr.msk.bf16.vlgmr.msra.gmra.mrb[16].mxu0 %vm286_vm1, %v1790_v17  ;;  %v853_v26 = vsel %vm290_vm0, %v850_v21, 0 }
  0xb9   : > { %906 = vmatpush1.bf16.msra.mxu0 %v900_v20  ;;  %937 = vmatprep.mubr.bf16.mxu0 %v1532_v0 }
  0xba   : > { %v947_v22 = vpop.permute.xlu1 %946  ;;  %v849_v24 = vpop.permute.xlu0 %848 }
  0xbb   : > { %v851_v25 = vsel %vm283_vm2, %v847_v18, %v849_v24  ;;  %v254_v18 = vmul.f32 %v251_v15, %v251_v15 }
  0xbc   : > { %1481 = vmatprep.subr.msk.bf16.mxu1 %vm290_vm0, %v851_v25 }
  0xbd   : > { %859 = vmatpush1.bf16.msra.mxu1 %v853_v26 }
  0xbe   : > { %v951_v11 = vpop.permute.xlu1 %950  ;;  %v949_v27 = vpop.permute.xlu0 %948 }
  0xbf   : > { %v952_v12 = vsel %vm396_vm3, %v947_v22, %v949_v27  ;;  %v953_v28 = vsel %vm396_vm3, %v949_v27, %v951_v11 }
  0xc0   : > { %v955_v29 = vsel %vm290_vm0, %v952_v12, 0  ;;  %1485 = vmatprep.subr.msk.bf16.mxu1 %vm290_vm0, %v953_v28  ;;  %1482 = vmatmul.mubr.msk.bf16.vlgmr.msra.gmra.mrb[16].mxu1 %vm286_vm1, %v1707_v23 }
  0xc1   : > { %961 = vmatpush1.bf16.msra.mxu1 %v955_v29  ;;  %1484 = vmatmul.mubr.msk.bf16.vlgmr.msra.gmra.mrb[20].mxu0 %vm286_vm1, %v1611_v8 }
  0xc2   : > { %v1006_v30 = vpop.permute.xlu1 %1005  ;;  %v1004_v31 = vpop.permute.xlu0 %1003  ;;  %992 = vmatprep.mubr.bf16.mxu1 %v1532_v0  ;;  %1049 = vmatprep.mubr.bf16.mxu0 %v1532_v0 }
  0xc3   : > { %v1009_v33 = vsel %vm459_vm4, %v1004_v31, %v1006_v30 }
  0xc4   : > { %v1012_v38 = vsel %vm290_vm0, %v1009_v33, 0 }
  0xc6   : > { %v1061_v34 = vpop.permute.xlu1 %1060  ;;  %v1008_v35 = vpop.permute.xlu0 %1007 }
  0xc7   : > { %v1010_v36 = vsel %vm459_vm4, %v1006_v30, %v1008_v35 }
  0xc8   : > { %1487 = vmatprep.subr.msk.bf16.mxu0 %vm290_vm0, %v1010_v36  ;;  %1486 = vmatmul.mubr.msk.bf16.vlgmr.msra.gmra.mrb[20].mxu1 %vm286_vm1, %v1720_v32 }
  0xc9   : > { %1018 = vmatpush1.bf16.msra.mxu0 %v1012_v38  ;;  %1106 = vmatprep.mubr.bf16.mxu1 %v1532_v0 }
  0xca   : > { %v1065_v8 = vpop.permute.xlu1 %1064  ;;  %v1063_v23 = vpop.permute.xlu0 %1062 }
  0xcb   : > { %v1066_v39 = vsel %vm522_vm5, %v1061_v34, %v1063_v23  ;;  %v1067_v40 = vsel %vm522_vm5, %v1063_v23, %v1065_v8 }
  0xcc   : > { %v1069_v41 = vsel %vm290_vm0, %v1066_v39, 0  ;;  %1489 = vmatprep.subr.msk.bf16.mxu1 %vm290_vm0, %v1067_v40  ;;  %1488 = vmatmul.mubr.msk.bf16.vlgmr.msra.gmra.mrb[24].mxu0 %vm286_vm1, %v1730_v37 }
  0xcd   : > { %1075 = vmatpush1.bf16.msra.mxu1 %v1069_v41  ;;  %1163 = vmatprep.mubr.bf16.mxu0 %v1532_v0 }
  0xce   : > { %v1120_v32 = vpop.permute.xlu1 %1119  ;;  %v1118_v42 = vpop.permute.xlu0 %1117 }
  0xcf   : > { %v1123_v44 = vsel %vm585_vm6, %v1118_v42, %v1120_v32 }
  0xd0   : > { %1490 = vmatmul.mubr.msk.bf16.vlgmr.msra.gmra.mrb[24].mxu1 %vm286_vm1, %v1742_v43  ;;  %v1126_v48 = vsel %vm290_vm0, %v1123_v44, 0 }
  0xd1   : > { %1220 = vmatprep.mubr.bf16.mxu1 %v1532_v0 }
  0xd2   : > { %v1175_v45 = vpop.permute.xlu1 %1174  ;;  %v1122_v46 = vpop.permute.xlu0 %1121 }
  0xd3   : > { %v1124_v47 = vsel %vm585_vm6, %v1120_v32, %v1122_v46 }
  0xd4   : > { %1491 = vmatprep.subr.msk.bf16.mxu0 %vm290_vm0, %v1124_v47 }
  0xd5   : > { %1132 = vmatpush1.bf16.msra.mxu0 %v1126_v48 }
  0xd6   : > { %v1179_v37 = vpop.permute.xlu1 %1178  ;;  %v1177_v49 = vpop.permute.xlu0 %1176 }
  0xd7   : > { %v1180_v50 = vsel %vm648_vm7, %v1175_v45, %v1177_v49  ;;  %v1181_v52 = vsel %vm648_vm7, %v1177_v49, %v1179_v37 }
  0xd8   : > { %v1183_v43 = vsel %vm290_vm0, %v1180_v50, 0  ;;  %1492 = vmatmul.mubr.msk.bf16.vlgmr.msra.gmra.mrb[28].mxu0 %vm286_vm1, %v1755_v51  ;;  %1493 = vmatprep.subr.msk.bf16.mxu1 %vm290_vm0, %v1181_v52 }
  0xd9   : > { %1189 = vmatpush1.bf16.msra.mxu1 %v1183_v43  ;;  %1277 = vmatprep.mubr.bf16.mxu0 %v1532_v0 }
  0xda   : > { %v1234_v53 = vpop.permute.xlu1 %1233  ;;  %v1232_v54 = vpop.permute.xlu0 %1231 }
  0xdb   : > { %v1237_v55 = vsel %vm711_vm8, %v1232_v54, %v1234_v53 }
  0xdc   : > { %1494 = vmatmul.mubr.msk.bf16.vlgmr.msra.gmra.mrb[28].mxu1 %vm286_vm1, %v1766_v57  ;;  %v1240_v51 = vsel %vm290_vm0, %v1237_v55, 0 }
  0xdd   : > { %1334 = vmatprep.mubr.bf16.mxu1 %v1532_v0 }
  0xde   : > { %v1289_v56 = vpop.permute.xlu1 %1288  ;;  %v1236_v58 = vpop.permute.xlu0 %1235 }
  0xdf   : > { %v1238_v59 = vsel %vm711_vm8, %v1234_v53, %v1236_v58 }
  0xe0   : > { %1495 = vmatprep.subr.msk.bf16.mxu0 %vm290_vm0, %v1238_v59 }
  0xe1   : > { %1246 = vmatpush1.bf16.msra.mxu0 %v1240_v51 }
  0xe2   : > { %v1293_v60 = vpop.permute.xlu1 %1292  ;;  %v1291_v61 = vpop.permute.xlu0 %1290 }
  0xe3   : > { %v1294_v62 = vsel %vm774_vm9, %v1289_v56, %v1291_v61  ;;  %v1295_v63 = vsel %vm774_vm9, %v1291_v61, %v1293_v60 }
  0xe4   : > { %v1297_v57 = vsel %vm290_vm0, %v1294_v62, 0  ;;  %1496 = vmatmul.mubr.msk.bf16.vlgmr.msra.gmra.mrb[32].mxu0 %vm286_vm1, %v1779_v5  ;;  %1497 = vmatprep.subr.msk.bf16.mxu1 %vm290_vm0, %v1295_v63  ;;  %v253_v5 = vmul.f32 %v250_v14, %v250_v14 }
  0xe5   : > { %1303 = vmatpush1.bf16.msra.mxu1 %v1297_v57 }
  0xe6   : > { %v256_v20 = vadd.f32 %v254_v18, %v253_v5 }
  0xe8   : > { %1498 = vmatmul.mubr.msk.bf16.vlgmr.msra.gmra.mrb[32].mxu1 %vm286_vm1, %v1790_v17  ;;  %v257_v21 = vadd.f32 %v256_v20, %v255_v19 }
  0xea   : > { %258 = vadd.xlane.f32.xlu1 %v257_v21 }
  0xec   : > { %v381_v0 = vpop.f32.mrb[0].mxu1 }
  0xed   : > { %v383_v4 = vpop.f32.mrb[1].mxu1 }
  0xee   : > { %v385_v6 = vpop.f32.mrb[2].mxu1 }
  0xef   : > { %v386_v7 = vpop.f32.mrb[3].mxu1 }
 0x163   : > { %v331_v17 = vpop.f32.mrb[0].mxu0 }
 0x164   : > { %v333_v22 = vpop.f32.mrb[1].mxu0  ;;  %v382_v24 = vadd.f32 %v381_v0, %v331_v17 }
 0x165   : > { %v335_v25 = vpop.f32.mrb[2].mxu0  ;;  %v384_v26 = vadd.f32 %v383_v4, %v333_v22 }
 0x166   : > { %v336_v11 = vpop.f32.mrb[3].mxu0 }
 0x16b   : > { %v442_v27 = vpop.f32.mrb[4].mxu0 }
 0x16c   : > { %v449_v2 = vadd.f32 %v442_v27, %v382_v24  ;;  %v444_v10 = vpop.f32.mrb[5].mxu0 }
 0x16d   : > { %v450_v12 = vadd.f32 %v444_v10, %v384_v26  ;;  %v446_v3 = vpop.f32.mrb[6].mxu0 }
 0x16e   : > { %v447_v9 = vpop.f32.mrb[7].mxu0 }
 0x16f   : > { %v505_v28 = vpop.f32.mrb[4].mxu1 }
 0x170   : > { %v512_v1 = vadd.f32 %v505_v28, %v449_v2  ;;  %v507_v13 = vpop.f32.mrb[5].mxu1 }
 0x171   : > { %v513_v29 = vadd.f32 %v507_v13, %v450_v12  ;;  %v509_v30 = vpop.f32.mrb[6].mxu1 }
 0x172   : > { %v510_v31 = vpop.f32.mrb[7].mxu1 }
 0x173   : > { %v568_v33 = vpop.f32.mrb[8].mxu0 }
 0x174   : > { %v575_v34 = vadd.f32 %v568_v33, %v512_v1  ;;  %v570_v35 = vpop.f32.mrb[9].mxu0 }
 0x175   : > { %v576_v36 = vadd.f32 %v570_v35, %v513_v29  ;;  %v572_v38 = vpop.f32.mrb[10].mxu0 }
 0x176   : > { %v573_v8 = vpop.f32.mrb[11].mxu0 }
 0x17b   : > { %v631_v23 = vpop.f32.mrb[8].mxu1 }
 0x17c   : > { %v638_v39 = vadd.f32 %v631_v23, %v575_v34  ;;  %v633_v40 = vpop.f32.mrb[9].mxu1  ;;  %v1353_v23 = vlaneseq }
 0x17d   : > { %v639_v41 = vadd.f32 %v633_v40, %v576_v36  ;;  %v635_v32 = vpop.f32.mrb[10].mxu1 }
 0x17e   : > { %v636_v42 = vpop.f32.mrb[11].mxu1  ;;  %v1354_v32 = vshrl.u32 %v1353_v23, 7 }
 0x17f   : > { %v694_v44 = vpop.f32.mrb[12].mxu0  ;;  %v832_v42 = vpop.permute.xlu0 %831 }
 0x180   : > { %v701_v45 = vadd.f32 %v694_v44, %v638_v39  ;;  %v696_v46 = vpop.f32.mrb[13].mxu0 }
 0x181   : > { %v702_v47 = vadd.f32 %v696_v46, %v639_v41  ;;  %v698_v48 = vpop.f32.mrb[14].mxu0 }
 0x182   : > { %v699_v37 = vpop.f32.mrb[15].mxu0 }
 0x187   : > { %v757_v49 = vpop.f32.mrb[12].mxu1 }
 0x188   : > { %v764_v50 = vadd.f32 %v757_v49, %v701_v45  ;;  %v759_v52 = vpop.f32.mrb[13].mxu1 }
 0x189   : > { %v765_v43 = vadd.f32 %v759_v52, %v702_v47  ;;  %v761_v53 = vpop.f32.mrb[14].mxu1 }
 0x18a   : > { %v762_v54 = vpop.f32.mrb[15].mxu1 }
 0x18b   : > { %v820_v55 = vpop.f32.mrb[16].mxu0  ;;  %v1351_v54 = vld [vmem:[%s1877_s4] sm:$0x3] }
 0x18c   : > { %v827_v56 = vadd.f32 %v820_v55, %v764_v50  ;;  %v822_v58 = vpop.f32.mrb[17].mxu0  ;;  %v1355_v50 = vsub.s32 0, %v1354_v32  ;;  %v1359_v55 = vsub.s32 1, %v1354_v32 }
 0x18d   : > { %v828_v59 = vadd.f32 %v822_v58, %v765_v43  ;;  %v824_v51 = vpop.f32.mrb[18].mxu0 }
 0x18e   : > { %v825_v60 = vpop.f32.mrb[19].mxu0  ;;  %v834_v48 = vadd.f32 %v832_v42, %v827_v56  ;;  %v1360_v56 = vrot.slane %v1351_v54, %v1359_v55 }
 0x18f   : > { %v835_v52 = vadd.f32 %v832_v42, %v828_v59 }
 0x193   : > { %v892_v61 = vpop.f32.mrb[16].mxu1 }
 0x194   : > { %v894_v62 = vpop.f32.mrb[17].mxu1  ;;  %v939_v63 = vpop.f32.mrb[20].mxu0 }
 0x195   : > { %v896_v57 = vpop.f32.mrb[18].mxu1  ;;  %v940_v0 = vadd.f32 %v939_v63, %v892_v61  ;;  %v941_v4 = vpop.f32.mrb[21].mxu0  ;;  %v836_v61 = vmax.f32 %v834_v48, 0.0  ;;  %v1356_v63 = vrot.slane %v1351_v54, %v1355_v50 }
 0x196   : > { %v897_v6 = vpop.f32.mrb[19].mxu1  ;;  %v942_v7 = vadd.f32 %v941_v4, %v894_v62  ;;  %v943_v14 = vpop.f32.mrb[22].mxu0  ;;  %v837_v57 = vmax.f32 %v835_v52, 0.0 }
 0x197   : > { %v944_v15 = vpop.f32.mrb[23].mxu0 }
 0x19b   : > { %v994_v16 = vpop.f32.mrb[20].mxu1 }
 0x19c   : > { %v1001_v5 = vadd.f32 %v994_v16, %v940_v0  ;;  %v996_v18 = vpop.f32.mrb[21].mxu1 }
 0x19d   : > { %v1002_v19 = vadd.f32 %v996_v18, %v942_v7  ;;  %v998_v20 = vpop.f32.mrb[22].mxu1 }
 0x19e   : > { %v999_v21 = vpop.f32.mrb[23].mxu1 }
 0x19f   : > { %v1051_v17 = vpop.f32.mrb[24].mxu0 }
 0x1a0   : > { %v1058_v22 = vadd.f32 %v1051_v17, %v1001_v5  ;;  %v1053_v24 = vpop.f32.mrb[25].mxu0  ;;  %v259_v5 = vpop.xlane.xlu1 %258 }
 0x1a1   : > { %v1059_v25 = vadd.f32 %v1053_v24, %v1002_v19  ;;  %v1055_v26 = vpop.f32.mrb[26].mxu0  ;;  %v260_v18 = vrot.slane %v259_v5, 4 }
 0x1a2   : > { %v1056_v11 = vpop.f32.mrb[27].mxu0 }
 0x1a3   : > { %v1108_v27 = vpop.f32.mrb[24].mxu1  ;;  %v261_v19 = vadd.f32 %v260_v18, %v259_v5 }
 0x1a4   : > { %v1115_v2 = vadd.f32 %v1108_v27, %v1058_v22  ;;  %v1110_v10 = vpop.f32.mrb[25].mxu1 }
 0x1a5   : > { %v1116_v12 = vadd.f32 %v1110_v10, %v1059_v25  ;;  %v1112_v3 = vpop.f32.mrb[26].mxu1  ;;  %v262_v20 = vrot.slane %v261_v19, 2 }
 0x1a6   : > { %v1113_v9 = vpop.f32.mrb[27].mxu1 }
 0x1a7   : > { %v263_v21 = vadd.f32 %v262_v20, %v261_v19 }
 0x1a9   : > { %v264_v17 = vrot.slane %v263_v21, 1 }
 0x1ab   : > { %v1165_v28 = vpop.f32.mrb[28].mxu0  ;;  %v265_v22 = vadd.f32 %v264_v17, %v263_v21 }
 0x1ac   : > { %v1172_v1 = vadd.f32 %v1165_v28, %v1115_v2  ;;  %v1167_v13 = vpop.f32.mrb[29].mxu0 }
 0x1ad   : > { %v1173_v29 = vadd.f32 %v1167_v13, %v1116_v12  ;;  %v1169_v30 = vpop.f32.mrb[30].mxu0  ;;  %1502 = vpush %v265_v22 }
 0x1ae   : > { %v1170_v31 = vpop.f32.mrb[31].mxu0 }
 0x1af   : > { %v1222_v33 = vpop.f32.mrb[28].mxu1 }
 0x1b0   : > { %v1229_v34 = vadd.f32 %v1222_v33, %v1172_v1  ;;  %v1224_v35 = vpop.f32.mrb[29].mxu1 }
 0x1b1   : > { %v1230_v36 = vadd.f32 %v1224_v35, %v1173_v29  ;;  %v1226_v38 = vpop.f32.mrb[30].mxu1 }
 0x1b2   : > { %v1227_v8 = vpop.f32.mrb[31].mxu1 }
 0x1b7   : > { %v1279_v39 = vpop.f32.mrb[32].mxu0 }
 0x1b8   : > { %v1286_v40 = vadd.f32 %v1279_v39, %v1229_v34  ;;  %v1281_v41 = vpop.f32.mrb[33].mxu0 }
 0x1b9   : > { %v1287_v44 = vadd.f32 %v1281_v41, %v1230_v36  ;;  %v1283_v45 = vpop.f32.mrb[34].mxu0 }
 0x1ba   : > { %v1284_v46 = vpop.f32.mrb[35].mxu0 }
 0x1bb   : > { %v1336_v47 = vpop.f32.mrb[32].mxu1 }
 0x1bc   : > { %v1343_v37 = vadd.f32 %v1336_v47, %v1286_v40  ;;  %v1338_v49 = vpop.f32.mrb[33].mxu1 }
 0x1bd   : > { %v1344_v43 = vadd.f32 %v1338_v49, %v1287_v44  ;;  %v1340_v53 = vpop.f32.mrb[34].mxu1 }
 0x1be   : > { %v1345_v58 = vadd.f32 %v1343_v37, %v832_v42  ;;  %v1341_v51 = vpop.f32.mrb[35].mxu1 }
 0x1bf   : > { %v1346_v60 = vadd.f32 %v1344_v43, %v832_v42 }
 0x1c0   : > { %v1347_v62 = vmax.f32 %v1345_v58, 0.0 }
 0x1c1   : > { %v1348_v0 = vmax.f32 %v1346_v60, 0.0 }
 0x1c2   : > { %v1349_v4 = vsub.f32 %v836_v61, %v1347_v62 }
 0x1c3   : > { %v1350_v6 = vsub.f32 %v837_v57, %v1348_v0 }
 0x1c4   : > { %v1363_v7 = vmul.f32 %v1356_v63, %v1349_v4 }
 0x1c5   : > { %v1364_v59 = vmul.f32 %v1360_v56, %v1350_v6 }
 0x1c6   : > { %v1365_v14 = vmul.f32 %v1363_v7, %v1363_v7 }
 0x1c7   : > { %v1366_v15 = vmul.f32 %v1364_v59, %v1364_v59 }
 0x1c9   : > { %v1367_v16 = vadd.f32 %v1366_v15, %v1365_v14 }
 0x1cb   : > { %1368 = vadd.xlane.f32.xlu0 %v1367_v16 }
 0x1de   : > { %s1503_s9 = spop %1502 }
 0x1df   : > { %s1377_s11 = smul.f32 0.00048828125, %s1503_s9 }
 0x258   : > { %v1369_v24 = vpop.xlane.xlu0 %1368 }
 0x259   : > { %v1370_v25 = vrot.slane %v1369_v24, 4 }
 0x25b   : > { %v1371_v26 = vadd.f32 %v1370_v25, %v1369_v24 }
 0x25d   : > { %v1372_v11 = vrot.slane %v1371_v26, 2 }
 0x25f   : > { %v1373_v27 = vadd.f32 %v1372_v11, %v1371_v26 }
 0x261   : > { %v1374_v2 = vrot.slane %v1373_v27, 1 }
 0x263   : > { %v1375_v10 = vadd.f32 %v1374_v2, %v1373_v27 }
 0x265   : > { %1504 = vpush %v1375_v10 }
 0x296   : > { %s1505_s12 = spop %1504 }
 0x297   : > { %s1378_s13 = smul.f32 0.00031887754, %s1505_s12 }
 0x299   : > { %s1379_s17 = sadd.f32 %s1378_s13, %s1377_s11 }
 0x29b   : > { %v1380_v12 = vstv %s1379_s17 }
 0x29c   : > { %1381 = vst [vmem:[%s242_s16] sm:$0xff] %v1380_v12 }
 0x29d PF: > { %s15_s18 = sadd.s32 1, %s1530_s18  }
 0x29e   : > { %p12_p4 = scmp.ge.s32.totalorder %s15_s18, 4  }
 0x2a0   :  { %14 = sbr.rel (!%p12_p4) target bundleno = 1 (0x1), region = 81 }

</bundles_post_ra>
